<compile_context>
chip_gen: v7x
topology: tpu7x:2x2x1
jax: 0.10.0
libtpu: 0.0.40
codegen_flags: <defaults>
</compile_context>

<pallas_src>
import jax
import jax.numpy as jnp
from jax.experimental import pallas as pl
from jax.experimental.pallas import tpu as pltpu


# ------------------------------ tiling helpers ------------------------------ #
_SUBLANE_BY_BYTES = {1: 32, 2: 16, 4: 8}


def _round_up(x, m):
    return ((x + m - 1) // m) * m


def _vmem_budget_bytes(frac=0.25, fallback=16 << 20):
    """Per-pipeline working-set budget, derived from physical VMEM (gen-aware)."""
    try:
        return max(fallback, int(pltpu.get_tpu_info().vmem_capacity_bytes * frac))
    except Exception:  # no TPU info available (interpret mode, old runtime, ...)
        return fallback


def _vmem_limit_bytes():
    """Scoped-VMEM override for CompilerParams (None -> compiler default)."""
    try:
        return int(min(pltpu.get_tpu_info().vmem_capacity_bytes // 2, 64 << 20))
    except Exception:
        return None


def _pick_tile_b(b, tile_b, sublane, per_row_bytes, fixed_bytes=0):
    """Clamp tile_b to the VMEM budget, round to the sublane multiple, and
    split the batch into >=2 tiles when large enough to feed both v7x cores."""
    budget = max(sublane * per_row_bytes, _vmem_budget_bytes() - fixed_bytes)
    tile_b = min(tile_b, max(sublane, budget // max(per_row_bytes, 1)))
    if b >= 256:                       # keep >=128 rows/tile; enables megacore split
        tile_b = min(tile_b, _round_up(-(-b // 2), sublane))
    if tile_b >= b:
        return b                       # full dim is always a legal block shape
    return max(sublane, (tile_b // sublane) * sublane)


# ------------------------- sparse2dense (scatter) --------------------------- #
def _sparse2dense_kernel(idx_ref, out_ref):
    # idx_ref: (TILE_B, K) int32 ; out_ref: (TILE_B, TILE_D) out-dtype
    j = pl.program_id(1)                                   # feature-tile index
    tb, td = out_ref.shape
    idx_local = idx_ref[...] - j * td                      # (tb, K) subtract — cheap
    col = jax.lax.broadcasted_iota(jnp.int32, (tb, td), 1)
    # K is small & static: unrolled boolean-OR scatter (set semantics — duplicate
    # indices stay 1), single cast to the store dtype at the end.
    hot = col == idx_local[:, 0:1]
    for k in range(1, idx_ref.shape[1]):
        hot = hot | (col == idx_local[:, k:k + 1])
    out_ref[...] = hot.astype(out_ref.dtype)


def sparse2dense(indices, in_dim, *, tile_b=256, tile_d=512, dtype=jnp.bfloat16):
    """Multi-hot encode (B, K) int indices into a (B, in_dim) matrix.

    Values are exactly 0/1, so bf16 (default) is lossless and halves the HBM
    store traffic of this store-bound kernel.
    """
    indices = jnp.asarray(indices, jnp.int32)
    b, k = indices.shape
    ebytes = jnp.dtype(dtype).itemsize
    sublane = _SUBLANE_BY_BYTES.get(ebytes, 8)

    if tile_d >= in_dim:
        tile_d = in_dim                                    # full D dim — always legal
    else:
        tile_d = max(128, (tile_d // 128) * 128)           # lane-dense, multiple of 128

    # per-row working set: 2x double-buffered output + ~6B/elem intermediates + idx.
    per_row = tile_d * (2 * ebytes + 6) + 8 * k
    tile_b = _pick_tile_b(b, tile_b, sublane, per_row)

    grid = (pl.cdiv(b, tile_b), pl.cdiv(in_dim, tile_d))
    return pl.pallas_call(
        _sparse2dense_kernel,
        out_shape=jax.ShapeDtypeStruct((b, in_dim), dtype),
        grid=grid,
        in_specs=[pl.BlockSpec((tile_b, k), lambda i, j: (i, 0))],
        out_specs=pl.BlockSpec((tile_b, tile_d), lambda i, j: (i, j)),
        compiler_params=pltpu.CompilerParams(
            dimension_semantics=("parallel", "parallel"),
            vmem_limit_bytes=_vmem_limit_bytes()),
    )(indices)


# ------------------------------- forward_std -------------------------------- #
def forward_std(batch):
    # torch.zeros(len(X_sparse)) — constant; no kernel launch needed.
    return jnp.zeros((batch,), jnp.float32)


# --------------- fused forward (stand-in linear head over multi-hot) -------- #
def _fused_forward_kernel(idx_ref, w_ref, pred_ref, acc_ref):
    # idx_ref: (TILE_B, K) int32 ; w_ref: (1, TILE_D) f32
    # pred_ref: (TILE_B, 1) f32  ; acc_ref: (TILE_B, 128) f32 scratch
    j = pl.program_id(1)                                   # D is the reduction axis

    @pl.when(j == 0)
    def _init():
        acc_ref[...] = jnp.zeros_like(acc_ref)

    tb, k_total = idx_ref.shape
    td = w_ref.shape[1]                                    # always a multiple of 128
    idx_local = idx_ref[...] - j * td                      # (tb, K) — offset off the iota
    col = jax.lax.broadcasted_iota(jnp.int32, (tb, td), 1)
    hot = col == idx_local[:, 0:1]
    for k in range(1, k_total):
        hot = hot | (col == idx_local[:, k:k + 1])

    # VPU select; accumulate per-128-lane partial sums into a lane-wide scratch.
    # The dense one-hot tile lives only in vregs and never touches HBM, and the
    # cross-lane XLU reduce happens exactly once per batch tile (at the last j).
    partial = jnp.where(hot, w_ref[...], 0.0)              # (tb, td) f32
    acc = acc_ref[...]
    for c in range(td // 128):                             # lane-aligned vreg columns
        acc = acc + partial[:, c * 128:(c + 1) * 128]
    acc_ref[...] = acc

    @pl.when(j == pl.num_programs(1) - 1)
    def _finalize():
        pred_ref[...] = jnp.sum(acc_ref[...], axis=-1, keepdims=True)


def forward(indices, w, *, tile_b=512, tile_d=1024, gather_threshold=32768):
    """Stand-in forward(): pred[b] = sum of w over the (unique) active indices."""
    indices = jnp.asarray(indices, jnp.int32)
    b, k = indices.shape
    d = int(w.shape[0])
    w = jnp.asarray(w, jnp.float32)

    if d >= gather_threshold:
        # O(B*K) embedding-style gather instead of the O(B*D*K) compare-scan.
        # TODO(synk): bag semantics here (duplicates counted twice); identical to
        # the one-hot scan only when indices are unique per row.
        return jnp.take(w, indices, axis=0).sum(axis=-1)

    # Pad the weight row to a multiple of tile_d (>=128): every D block is full,
    # padded lanes carry weight 0 and can never match a valid index.
    tile_d = max(128, (min(tile_d, _round_up(d, 128)) // 128) * 128)
    d_pad = _round_up(d, tile_d)
    w_row = jnp.zeros((1, d_pad), jnp.float32).at[0, :d].set(w)

    # per-row working set: ~3 f32 (tb,td) intermediates + idx + 128-lane scratch.
    per_row = 12 * tile_d + 8 * k + 512 + 8
    tile_b = _pick_tile_b(b, tile_b, 8, per_row, fixed_bytes=8 * tile_d)

    out = pl.pallas_call(
        _fused_forward_kernel,
        out_shape=jax.ShapeDtypeStruct((b, 1), jnp.float32),
        grid=(pl.cdiv(b, tile_b), d_pad // tile_d),
        in_specs=[pl.BlockSpec((tile_b, k), lambda i, j: (i, 0)),
                  pl.BlockSpec((1, tile_d), lambda i, j: (0, j))],
        out_specs=pl.BlockSpec((tile_b, 1), lambda i, j: (i, 0)),
        scratch_shapes=[pltpu.VMEM((tile_b, 128), jnp.float32)],
        compiler_params=pltpu.CompilerParams(
            dimension_semantics=("parallel", "arbitrary"),
            vmem_limit_bytes=_vmem_limit_bytes()),
    )(indices, w_row)
    return out.reshape(b)


# ---------------------------- forward_pessimistic --------------------------- #
def forward_pessimistic(indices, w, pessimism=1.0):
    pred = forward(indices, w)                 # single fused Pallas kernel
    std = forward_std(indices.shape[0])        # identically zero (trace time)
    return pred - pessimism * std


if __name__ == "__main__":
    B, K, D = 8, 4, 1024                       # batch, active indices per row, in_dim
    key = jax.random.PRNGKey(0)
    k_idx, k_w = jax.random.split(key)
    indices = jax.random.randint(k_idx, (B, K), 0, D, dtype=jnp.int32)
    w = jax.random.normal(k_w, (D,), dtype=jnp.float32)

    dense = jax.block_until_ready(sparse2dense(indices, D))           # bf16, exact 0/1
    std = forward_std(B)
    pess = jax.block_until_ready(forward_pessimistic(indices, w, pessimism=1.0))

    # Reference checks (plain JAX, set semantics like the PyTorch scatter)
    dense_ref = jnp.zeros((B, D), jnp.float32)
    for bb in range(B):
        dense_ref = dense_ref.at[bb, indices[bb]].set(1.0)
    pred_ref = dense_ref @ w

    assert jnp.allclose(dense.astype(jnp.float32), dense_ref), "sparse2dense mismatch"
    assert jnp.allclose(std, jnp.zeros(B)), "forward_std mismatch"
    assert jnp.allclose(pess, pred_ref - 1.0 * jnp.zeros(B), atol=1e-5, rtol=1e-5), \
        "forward_pessimistic mismatch"

    print("KERNEL_OK")
</pallas_src>

<mosaic_0001>
module attributes {stable_mosaic.version = 11 : i64} {
  func.func @_sparse2dense_kernel(%arg0: i32, %arg1: i32, %arg2: memref<8x4xi32, #tpu.memory_space<vmem>>, %arg3: memref<8x512xbf16, #tpu.memory_space<vmem>>) attributes {dimension_semantics = [#tpu.dimension_semantics<parallel>, #tpu.dimension_semantics<parallel>], iteration_bounds = array<i64: 1, 2>, scalar_prefetch = 0 : i64, scratch_operands = 0 : i64, tpu.core_type = #tpu.core_type<tc>, window_params = [{transform_indices = @transform_0, window_bounds = array<i64: 8, 4>}, {transform_indices = @transform_1, window_bounds = array<i64: 8, 512>}]} {
    %c0 = arith.constant 0 : index
    %c0_0 = arith.constant 0 : index
    %0 = vector.load %arg2[%c0, %c0_0] : memref<8x4xi32, #tpu.memory_space<vmem>>, vector<8x4xi32>
    %c512_i32 = arith.constant 512 : i32
    %1 = arith.muli %arg1, %c512_i32 : i32
    %2 = vector.broadcast %1 : i32 to vector<8x4xi32>
    %3 = arith.subi %0, %2 : vector<8x4xi32>
    %4 = tpu.iota {dimensions = array<i32: 1>} : vector<8x512xi32>
    %5 = vector.extract_strided_slice %3 {offsets = [0, 0], sizes = [8, 1], strides = [1, 1]} : vector<8x4xi32> to vector<8x1xi32>
    %6 = vector.broadcast %5 : vector<8x1xi32> to vector<8x512xi32>
    %7 = arith.cmpi eq, %4, %6 : vector<8x512xi32>
    %8 = vector.extract_strided_slice %3 {offsets = [0, 1], sizes = [8, 1], strides = [1, 1]} : vector<8x4xi32> to vector<8x1xi32>
    %9 = vector.broadcast %8 : vector<8x1xi32> to vector<8x512xi32>
    %10 = arith.cmpi eq, %4, %9 : vector<8x512xi32>
    %11 = arith.ori %7, %10 : vector<8x512xi1>
    %12 = vector.extract_strided_slice %3 {offsets = [0, 2], sizes = [8, 1], strides = [1, 1]} : vector<8x4xi32> to vector<8x1xi32>
    %13 = vector.broadcast %12 : vector<8x1xi32> to vector<8x512xi32>
    %14 = arith.cmpi eq, %4, %13 : vector<8x512xi32>
    %15 = arith.ori %11, %14 : vector<8x512xi1>
    %16 = vector.extract_strided_slice %3 {offsets = [0, 3], sizes = [8, 1], strides = [1, 1]} : vector<8x4xi32> to vector<8x1xi32>
    %17 = vector.broadcast %16 : vector<8x1xi32> to vector<8x512xi32>
    %18 = arith.cmpi eq, %4, %17 : vector<8x512xi32>
    %19 = arith.ori %15, %18 : vector<8x512xi1>
    %20 = arith.extui %19 : vector<8x512xi1> to vector<8x512xi32>
    %21 = arith.sitofp %20 : vector<8x512xi32> to vector<8x512xf32>
    %22 = arith.truncf %21 : vector<8x512xf32> to vector<8x512xbf16>
    %c0_1 = arith.constant 0 : index
    %c0_2 = arith.constant 0 : index
    %23 = vector.load %arg3[%c0_1, %c0_2] : memref<8x512xbf16, #tpu.memory_space<vmem>>, vector<8x512xbf16>
    tpu.vector_store %arg3[%c0_1, %c0_2], %22 {strides = array<i32>} : memref<8x512xbf16, #tpu.memory_space<vmem>>, vector<8x512xbf16>,
    return
  }
  func.func @transform_0(%arg0: i32, %arg1: i32) -> (i32, i32) {
    %c0_i32 = arith.constant 0 : i32
    %c0_i32_0 = arith.constant 0 : i32
    return %arg0, %c0_i32 : i32, i32
  }
  func.func @transform_1(%arg0: i32, %arg1: i32) -> (i32, i32) {
    %c0_i32 = arith.constant 0 : i32
    return %arg0, %arg1 : i32, i32
  }
}

</mosaic_0001>

<bundles_post_ra>
// kernel: tpu_custom_call.1
= control target key start
LH: loop header
LB: loop body
LE: loop exit
PB: predicated region body
PF: predicated region fallthrough
CT: control target
= control target key end

     0   :  { %6 = vsyncpa [#allocation3], 0  ;;  %s589_s0 = inlined_call_operand.vmem [shape: s32[8,4], index: 0, kind: input, shape index: {}]   ;;  %s590_s1 = inlined_call_operand.hbm [shape: bf16[8,1024], index: 1, kind: output, shape index: {}]  }
   0x1   :  { %8 = vsyncpa [#allocation3 + $0x1], 0  ;;  %s474_s6 = smov 0   ;;  %s476_s7 = smov 0  }
   0x2   :  { %s478_s8 = smov 0   ;;  %s480_s9 = smov 0  }
   0x3   :  { %s482_s10 = smov 0   ;;  %s484_s11 = smov 0  }
   0x4 LB: > { %s292_s12 = sadd.s32 4294967295, %s456_s11   ;;  %s293_s13 = sadd.s32 4294967294, %s456_s11   ;;  %s456_s11 = sphi %s484_s11, %s14_s11   ;;  %s452_s10 = sphi %s482_s10, %s597_s10   ;;  %s448_s9 = sphi %s480_s9, %s596_s9   ;;  %s444_s8 = sphi %s478_s8, %s595_s8   ;;  %s440_s7 = sphi %s476_s7, %s594_s7   ;;  %s436_s6 = sphi %s474_s6, %s593_s6  }
   0x5   : > { %s23_s14 = sadd.s32 1, %s452_s10  ;;  %s61_s15 = sadd.s32 1, %s444_s8 }
   0x6   : > { %p24_p0 = scmp.ge.s32.totalorder %s23_s14, 2  ;;  %p71_p1 = scmp.ne.s32.totalorder %s444_s8, %s440_s7 }
   0x7   : > { %p72_p2 = scmp.eq.s32.totalorder %s292_s12, 1  ;;  %p77_p3 = scmp.ne.s32.totalorder %s440_s7, %s436_s6 }
   0x8   : > { %s599_s14 = smov (%p24_p0, %s23_s14), 0  ;;  %p78_p5 = scmp.eq.s32.totalorder %s293_s13, 1 }
   0x9   : > { %p514_p4 = por %p72_p2, %p71_p1  ;;  %s57_s17 = ssub.s32 %s452_s10, %s599_s14 }
   0xa   : > { %p296_p6 = scmp.ge.s32.totalorder %s456_s11, 1  ;;  %p59_p7 = scmp.eq.s32.totalorder %s57_s17, 0 }
   0xb   : > { %p521_p8 = por %p78_p5, %p77_p3  ;;  %p103_p9 = scmp.lt.s32.totalorder %s456_s11, 3 }
   0xc   : > { %s527_s19 = scalar_select %p59_p7, %s444_s8, %s61_s15  }
   0xd   : > { %p104_p10 = pnand %p296_p6, %p103_p9 }
   0xe   : > { %v127_v0 = vld [vmem:[%s589_s0] sm:$0xff] (!%p104_p10)  ;;  %s298_s22 = sshll.u32 (!%p104_p10), %s448_s9, 9  ;;  %v458_v1 = vmov (!%p104_p10), 0   ;;  %v459_v3 = vmov (!%p104_p10), 2   ;;  %v460_v5 = vmov (!%p104_p10), 1   ;;  %v461_v6 = vmov (!%p104_p10), 3  }
   0xf   : > { %107 = sbr.rel (%p104_p10) target bundleno = 181 (0xb5), region = 24  ;;  %373 = vset.pattern.permute.xlu0 (!%p104_p10), %v458_v1  ;;  %v129_v2 = vstv (!%p104_p10), %s298_s22  ;;  %375 = vset.pattern.permute.xlu1 (!%p104_p10), %v459_v3  ;;  %v131_v7 = vlaneseq (!%p104_p10)  ;;  %s119_s23 = sand.u32 (!%p104_p10), 1, %s440_s7   ;;  %v462_v16 = vmov (!%p104_p10), 0.0  }
  0x10   : > { %v130_v4 = vsub.s32 (!%p104_p10), %v127_v0, %v129_v2  ;;  %s297_s24 = sshll.u32 (!%p104_p10), %s119_s23, 4  ;;  %s312_s25 = sshll.u32 (!%p104_p10), %s448_s9, 8 }
  0x11   : > { %v132_v8 = vand.u32 (!%p104_p10), 127, %v131_v7  ;;  %s121_s26 = scalar_lea.vmem (!%p104_p10), [#allocation2], %s297_s24  ;;  %s540_s30 = scalar_lea.hbm (!%p104_p10), %s590_s1, %s312_s25 }
  0x12   : > { %137 = vperm.xlu0 (!%p104_p10), %373, %v130_v4   ;;  %155 = vperm.xlu1 (!%p104_p10), %375, %v130_v4   ;;  %s219_s27 = sshll.u32 (!%p104_p10), %s121_s26, 4  ;;  %s203_s2 = scalar_lea.sflag (!%p104_p10), [#allocation3], %s119_s23  ;;  %s542_s27 = int_to_ptr.vmem [resolvable:$true] %s219_s27 }
  0x13   : > { %v133_v10 = vadd.s32 (!%p104_p10), 128, %v132_v8  ;;  %v134_v12 = vadd.s32 (!%p104_p10), 256, %v132_v8  ;;  %v135_v13 = vadd.s32 (!%p104_p10), 384, %v132_v8  ;;  %s378_s3 = scalar_lea.vmem (!%p104_p10), %s542_s27, 256  ;;  %s463_s4 = smov (!%p104_p10), [#allocation2]  }
  0x14   : > { %p379_p11 = scmp.ne.s32.totalorder (!%p104_p10), %s542_s27, %s378_s3  ;;  %s382_s5 = sshll.u32 (!%p104_p10), %s463_s4, 4  ;;  %s383_s5 = int_to_ptr.vmem [resolvable:$false] %s382_s5 }
  0x15   : > { %s384_s9 = scalar_lea.vmem (!%p104_p10), %s383_s5, 512  ;;  %p385_p0 = scmp.lt.s32.totalorder (!%p104_p10), %s542_s27, %s383_s5 }
  0x16   : > { %374 = vset.pattern.permute.xlu0 %v460_v5  ;;  %376 = vset.pattern.permute.xlu1 %v461_v6  ;;  %p380_p12 = pnand %p379_p11, %p514_p4  ;;  %p386_p1 = scmp.lt.s32.totalorder %s384_s9, %s378_s3 }
  0x17   : > { %144 = vperm.xlu0 %374, %v130_v4   ;;  %166 = vperm.xlu1 %376, %v130_v4  }
  0x18   : > { %p381_p13 = pneg %p380_p12  ;;  %p387_p2 = por %p386_p1, %p385_p0 }
  0x1a   : > { %p388_p3 = pnand %p387_p2, %p381_p13 }
  0x1b   : > { %377 = vset.pattern.permute.xlu0 %v461_v6 }
  0x91   : > { %v138_v9 = vpop.permute.xlu0 %137  ;;  %v156_v11 = vpop.permute.xlu1 %155 }
  0x92   : > { %vm139_vm0 = vcmp.eq.s32.totalorder %v132_v8, %v138_v9  ;;  %vm140_vm4 = vcmp.eq.s32.totalorder %v133_v10, %v138_v9  ;;  %vm141_vm7 = vcmp.eq.s32.totalorder %v134_v12, %v138_v9  ;;  %vm142_vm9 = vcmp.eq.s32.totalorder %v135_v13, %v138_v9 }
  0x93   : > { %vm157_vm11 = vcmp.eq.s32.totalorder %v132_v8, %v156_v11  ;;  %vm158_vm13 = vcmp.eq.s32.totalorder %v133_v10, %v156_v11  ;;  %vm159_vm15 = vcmp.eq.s32.totalorder %v134_v12, %v156_v11 }
  0x96   : > { %v145_v14 = vpop.permute.xlu0 %144  ;;  %v167_v15 = vpop.permute.xlu1 %166 }
  0x97   : > { %vm146_vm1 = vcmp.eq.s32.totalorder %v132_v8, %v145_v14  ;;  %vm147_vm2 = vcmp.eq.s32.totalorder %v133_v10, %v145_v14  ;;  %vm148_vm3 = vcmp.eq.s32.totalorder %v134_v12, %v145_v14  ;;  %vm149_vm5 = vcmp.eq.s32.totalorder %v135_v13, %v145_v14 }
  0x98   : > { %vm150_vm6 = vmor %vm139_vm0, %vm146_vm1  ;;  %vm168_vm1 = vcmp.eq.s32.totalorder %v132_v8, %v167_v15 }
  0x99   : > { %vm151_vm8 = vmor %vm140_vm4, %vm147_vm2  ;;  %vm160_vm2 = vcmp.eq.s32.totalorder %v135_v13, %v156_v11 }
  0x9a   : > { %vm152_vm10 = vmor %vm141_vm7, %vm148_vm3  ;;  %vm169_vm3 = vcmp.eq.s32.totalorder %v133_v10, %v167_v15 }
  0x9b   : > { %vm153_vm12 = vmor %vm142_vm9, %vm149_vm5  ;;  %vm170_vm5 = vcmp.eq.s32.totalorder %v134_v12, %v167_v15  ;;  %vm171_vm9 = vcmp.eq.s32.totalorder %v135_v13, %v167_v15 }
  0x9c   : > { %vm161_vm14 = vmor %vm150_vm6, %vm157_vm11 }
  0x9d   : > { %vm162_vm0 = vmor %vm151_vm8, %vm158_vm13 }
  0x9e   : > { %vm163_vm4 = vmor %vm152_vm10, %vm159_vm15 }
  0x9f   : > { %vm164_vm7 = vmor %vm153_vm12, %vm160_vm2 }
  0xa0   : > { %vm172_vm6 = vmor %vm161_vm14, %vm168_vm1 }
  0xa1   : > { %vm173_vm11 = vmor %vm162_vm0, %vm169_vm3  ;;  %v299_v17 = vsel %vm172_vm6, 1.0, %v462_v16 }
  0xa2   : > { %vm174_vm8 = vmor %vm163_vm4, %vm170_vm5  ;;  %v300_v18 = vsel %vm173_vm11, 1.0, %v462_v16 }
  0xa3   : > { %vm175_vm13 = vmor %vm164_vm7, %vm171_vm9  ;;  %v301_v19 = vsel %vm174_vm8, 1.0, %v462_v16  ;;  %v310_v20 = vpack.c.bf16 %v300_v18, %v299_v17 }
  0xa4   : > { %v302_v21 = vsel %vm175_vm13, 1.0, %v462_v16 }
  0xa5   : > { %v311_v22 = vpack.c.bf16 %v302_v21, %v301_v19  ;;  %200 = vst [vmem:[%s121_s26] sm:$0xff] %v310_v20 }
  0xa7   : > { %201 = vst [vmem:[%s121_s26 + $0x8] sm:$0xff] %v311_v22 }
  0xa8   : > { %391 = shalt.err (!%p388_p3)
}
  0xa9   : > { %s392_s12 = scalar_lea.hbm %s540_s30, 256  ;;  %s396_s17 = scalar_lea.hbm %s590_s1, 512 }
  0xaa   : > { %p393_p5 = scmp.ne.s32.totalorder %s540_s30, %s392_s12  ;;  %p397_p9 = scmp.lt.u32.totalorder %s540_s30, %s590_s1 }
  0xab   : > { %p398_p10 = scmp.lt.u32.totalorder %s396_s17, %s392_s12  ;;  %p400_p12 = scmp.lt.u32.totalorder %s392_s12, %s540_s30 }
  0xac   : > { %p394_p6 = pnand %p393_p5, %p514_p4 }
  0xad   : > { %p399_p11 = por %p398_p10, %p397_p9 }
  0xae   : > { %p395_p7 = pneg %p394_p6 }
  0xaf   : > { %p401_p13 = por %p400_p12, %p399_p11 }
  0xb1   : > { %p402_p0 = pnand %p401_p13, %p395_p7 }
  0xb3   : > { %405 = shalt.err (!%p402_p0)
}
  0xb4   : > { %313 = dma.vmem_to_hbm [thread:$0]  (%p514_p4), %s542_s27, 256, %s540_s30, %s203_s2  }
  0xb5 PF: > { %p319_p1 = scmp.ge.s32.totalorder %s456_s11, 2  ;;  %s231_s22 = sand.u32 1, %s436_s6  }
  0xb6   : > { %s232_s23 = scalar_lea.sflag [#allocation3], %s231_s22 }
  0xb7   : > { %p316_p2 = pnand %p319_p1, %p521_p8 }
  0xb9   : > { %431 = dma.done.wait (!%p316_p2), %s232_s23, 256  }
  0xba   : > { %433 = vsyncadd (!%p316_p2), %s232_s23, 4294967040  ;;  %s14_s11 = sadd.s32 1, %s456_s11   ;;  %s593_s6 = smov %s440_s7 }
  0xbb   : > { %p11_p3 = scmp.ge.s32.totalorder %s14_s11, 4   ;;  %s594_s7 = smov %s444_s8 }
  0xbc   : > { %s595_s8 = smov %s527_s19  ;;  %s596_s9 = smov %s452_s10 }
  0xbd   : > { %s597_s10 = smov %s599_s14  ;;  %13 = sbr.rel (!%p11_p3) target bundleno = 4 (0x4), region = 59 }
  0xc4   :  { %237 = vsyncpa [#allocation3], 1 }
  0xc5   :  { %239 = vsyncpa [#allocation3 + $0x1], 1 }

</bundles_post_ra>
